<compile_context>
chip_gen: v6e
topology: v6e:2x2x1
jax: 0.10.0
libtpu: 0.0.40
codegen_flags: <defaults>
</compile_context>

<pallas_src>
import functools

import jax
import jax.numpy as jnp
from jax import lax
from jax.experimental import pallas as pl
from jax.experimental.pallas import tpu as pltpu

LANE = 128                 # TPU lane width; last dim of every tile
DEFAULT_TILE_ROWS = 8192   # 8192 x 128 f32 = 4 MiB per input tile


# -----------------------------------------------------------------------------
# Kernel: fused IoU partial reductions over row-tiles.
#   o_ref[part, 0] <- sum over this part's rows of (p * t)   (per-lane partials)
#   o_ref[part, 1] <- sum over this part's rows of (p + t)
# Output block is resident across the inner ("arbitrary") axis -> accumulator.
# -----------------------------------------------------------------------------
def _iou_sums_kernel(p_ref, t_ref, o_ref, *, tile, steps, rows, need_mask):
    s = pl.program_id(1)

    @pl.when(s == 0)
    def _():
        o_ref[...] = jnp.zeros_like(o_ref)

    p = p_ref[...].astype(jnp.float32)   # cast on-chip (free under DMA)
    t = t_ref[...].astype(jnp.float32)

    if need_mask:
        # Zero rows that are logically out of range: the ragged last tile and
        # any duplicated (clamped) tiles when total_tiles % parts != 0.
        part = pl.program_id(0)
        row0 = (part * steps + s) * tile           # unclamped logical row base
        row_ids = row0 + lax.broadcasted_iota(jnp.int32, p.shape, 0)
        keep = row_ids < rows
        p = jnp.where(keep, p, 0.0)
        t = jnp.where(keep, t, 0.0)

    # Sublane-fold to lane-width partials; pure vector adds into the resident
    # output block (cross-lane reduce happens once, in the wrapper).
    o_ref[0, 0] += jnp.sum(p * t, axis=0, keepdims=True)
    o_ref[0, 1] += jnp.sum(p + t, axis=0, keepdims=True)


def _iou_partial_sums(p2d, t2d, tile, parts, steps, total_tiles):
    rows = p2d.shape[0]
    need_mask = (rows % tile != 0) or (parts * steps != total_tiles)

    if parts * steps == total_tiles:
        def in_idx(part, s):
            return (part * steps + s, 0)
    else:
        # Clamp duplicated tail tiles onto the last real tile; the kernel mask
        # zeroes their contribution.
        def in_idx(part, s):
            return (jnp.minimum(part * steps + s, total_tiles - 1), 0)

    kernel = functools.partial(_iou_sums_kernel, tile=tile, steps=steps,
                               rows=rows, need_mask=need_mask)

    # Double-buffered input tiles + small margin; floor 32 MiB, cap 64 MiB so
    # the setting stays legal on v7x (64 MiB physical per TC).
    bytes_per_step = tile * LANE * (p2d.dtype.itemsize + t2d.dtype.itemsize)
    vmem_limit = int(min(max(2 * bytes_per_step + (4 << 20), 32 << 20), 64 << 20))

    return pl.pallas_call(
        kernel,
        out_shape=jax.ShapeDtypeStruct((parts, 2, 1, LANE), jnp.float32),
        grid_spec=pltpu.PrefetchScalarGridSpec(
            num_scalar_prefetch=0,
            grid=(parts, steps),
            in_specs=[pl.BlockSpec((tile, LANE), in_idx),
                      pl.BlockSpec((tile, LANE), in_idx)],
            out_specs=pl.BlockSpec((1, 2, 1, LANE),
                                   lambda part, s: (part, 0, 0, 0)),
        ),
        compiler_params=pltpu.CompilerParams(
            dimension_semantics=("parallel", "arbitrary"),
            vmem_limit_bytes=vmem_limit,
        ),
    )(p2d, t2d)


def _to_stream_dtype(x):
    # Stream float dtypes natively (cast to f32 on-chip); cast bool/int once.
    if x.dtype == jnp.float32 or x.dtype == jnp.bfloat16 or x.dtype == jnp.float16:
        return x
    return x.astype(jnp.float32)


# -----------------------------------------------------------------------------
# IoULoss forward
# -----------------------------------------------------------------------------
@functools.partial(jax.jit, static_argnames=("smooth", "tile_rows"))
def iou_loss(y_pred, y_true, smooth=1.0, tile_rows=DEFAULT_TILE_ROWS):
    p = _to_stream_dtype(y_pred).reshape(-1)
    t = _to_stream_dtype(y_true).reshape(-1)
    n = p.shape[0]

    # Lane-dense (rows, 128) view. Zero-copy whenever n % 128 == 0 (the common
    # B*C*H*W case); otherwise a minimal zero pad to the next lane multiple
    # (zeros contribute nothing to any of the sums).
    rows = -(-n // LANE)
    pad = rows * LANE - n
    if pad:
        p = jnp.pad(p, (0, pad))
        t = jnp.pad(t, (0, pad))
    p2d = p.reshape(rows, LANE)
    t2d = t.reshape(rows, LANE)

    # Tile selection: whole array for small inputs (block == full dim is always
    # legal), otherwise a large sublane-aligned tile (multiple of 32 satisfies
    # f32 / bf16 / f16 sublane packing).
    tile_rows = max(32, (tile_rows // 32) * 32)
    if rows <= tile_rows:
        tile = rows
    else:
        tile = tile_rows
    total_tiles = -(-rows // tile)

    # Outer "parallel" axis lets v7x's two TensorCores split the stream; on
    # single-core chips it just runs sequentially.  Skip it when the (<= 1
    # tile) duplicate-read overhead would be a large fraction of the work.
    if total_tiles >= 2 and (total_tiles % 2 == 0 or total_tiles >= 8):
        parts = 2
    else:
        parts = 1
    steps = -(-total_tiles // parts)

    partial = _iou_partial_sums(p2d, t2d, tile, parts, steps, total_tiles)
    inter = jnp.sum(partial[:, 0])
    total = jnp.sum(partial[:, 1])
    union = total - inter
    iou = (inter + smooth) / (union + smooth)
    return 1.0 - iou


if __name__ == "__main__":
    key = jax.random.PRNGKey(0)
    k1, k2, k3, k4 = jax.random.split(key, 4)

    # --- Check 1: the module's typical dense case (zero-copy path) ----------
    B, C, H, W = 2, 4, 16, 16
    y_pred = jax.nn.sigmoid(jax.random.normal(k1, (B, C, H, W), jnp.float32))
    y_true = (jax.random.uniform(k2, (B, C, H, W), jnp.float32) > 0.5).astype(jnp.float32)

    loss = iou_loss(y_pred, y_true)
    jax.block_until_ready(loss)

    ref_inter = jnp.sum(y_pred * y_true)
    ref_total = jnp.sum(y_pred + y_true)
    ref_loss = 1.0 - (ref_inter + 1.0) / ((ref_total - ref_inter) + 1.0)
    assert bool(jnp.isfinite(loss))
    assert abs(float(loss) - float(ref_loss)) < 1e-5, (float(loss), float(ref_loss))

    # --- Check 2: ragged length + native bf16 pred + 2-part masked grid -----
    n2 = 4243
    p2f = jax.nn.sigmoid(jax.random.normal(k3, (n2,), jnp.float32))
    t2 = (jax.random.uniform(k4, (n2,), jnp.float32) > 0.5).astype(jnp.float32)
    p2 = p2f.astype(jnp.bfloat16)

    loss2 = iou_loss(p2, t2, tile_rows=32)
    jax.block_until_ready(loss2)

    p2r = p2.astype(jnp.float32)
    r_inter = jnp.sum(p2r * t2)
    r_total = jnp.sum(p2r + t2)
    r_loss = 1.0 - (r_inter + 1.0) / ((r_total - r_inter) + 1.0)
    assert bool(jnp.isfinite(loss2))
    assert abs(float(loss2) - float(r_loss)) < 1e-4, (float(loss2), float(r_loss))

    print("KERNEL_OK")
</pallas_src>

<mosaic_0001>
module attributes {stable_mosaic.version = 11 : i64} {
  func.func @_iou_sums_kernel(%arg0: i32, %arg1: i32, %arg2: memref<16x128xf32, #tpu.memory_space<vmem>>, %arg3: memref<16x128xf32, #tpu.memory_space<vmem>>, %arg4: memref<1x2x1x128xf32, #tpu.memory_space<vmem>>) attributes {dimension_semantics = [#tpu.dimension_semantics<parallel>, #tpu.dimension_semantics<arbitrary>], iteration_bounds = array<i64: 1, 1>, scalar_prefetch = 0 : i64, scratch_operands = 0 : i64, tpu.core_type = #tpu.core_type<tc>, window_params = [{transform_indices = @transform_0, window_bounds = array<i64: 16, 128>}, {transform_indices = @transform_1, window_bounds = array<i64: 16, 128>}, {transform_indices = @transform_2, window_bounds = array<i64: 1, 2, 1, 128>}]} {
    %c0_i32 = arith.constant 0 : i32
    %0 = arith.cmpi eq, %arg1, %c0_i32 : i32
    %1 = arith.extui %0 : i1 to i32
    %c0_i32_0 = arith.constant 0 : i32
    %2 = arith.cmpi ne, %1, %c0_i32_0 : i32
    scf.if %2 {
      %cst_20 = arith.constant 0.000000e+00 : f32
      %23 = vector.broadcast %cst_20 : f32 to vector<1x2x1x128xf32>
      %c0_21 = arith.constant 0 : index
      %c0_22 = arith.constant 0 : index
      %c0_23 = arith.constant 0 : index
      %c0_24 = arith.constant 0 : index
      %24 = vector.load %arg4[%c0_21, %c0_22, %c0_23, %c0_24] : memref<1x2x1x128xf32, #tpu.memory_space<vmem>>, vector<1x2x1x128xf32>
      tpu.vector_store %arg4[%c0_21, %c0_22, %c0_23, %c0_24], %23 {strides = array<i32>} : memref<1x2x1x128xf32, #tpu.memory_space<vmem>>, vector<1x2x1x128xf32>,
    } else {
    }
    %c0 = arith.constant 0 : index
    %c0_1 = arith.constant 0 : index
    %3 = vector.load %arg2[%c0, %c0_1] : memref<16x128xf32, #tpu.memory_space<vmem>>, vector<16x128xf32>
    %c0_2 = arith.constant 0 : index
    %c0_3 = arith.constant 0 : index
    %4 = vector.load %arg3[%c0_2, %c0_3] : memref<16x128xf32, #tpu.memory_space<vmem>>, vector<16x128xf32>
    %c0_4 = arith.constant 0 : index
    %c0_5 = arith.constant 0 : index
    %c0_6 = arith.constant 0 : index
    %c0_7 = arith.constant 0 : index
    %5 = vector.load %arg4[%c0_4, %c0_5, %c0_6, %c0_7] : memref<1x2x1x128xf32, #tpu.memory_space<vmem>>, vector<1x1x1x128xf32>
    %6 = vector.shape_cast %5 : vector<1x1x1x128xf32> to vector<1x128xf32>
    %7 = arith.mulf %3, %4 : vector<16x128xf32>
    %cst = arith.constant dense<0.000000e+00> : vector<128xf32>
    %8 = vector.multi_reduction <add>, %7, %cst [0] : vector<16x128xf32> to vector<128xf32>
    %9 = vector.shape_cast %8 : vector<128xf32> to vector<1x128xf32>
    %10 = arith.addf %6, %9 : vector<1x128xf32>
    %c0_8 = arith.constant 0 : index
    %c0_9 = arith.constant 0 : index
    %c0_10 = arith.constant 0 : index
    %c0_11 = arith.constant 0 : index
    %11 = vector.load %arg4[%c0_8, %c0_9, %c0_10, %c0_11] : memref<1x2x1x128xf32, #tpu.memory_space<vmem>>, vector<1x1x1x128xf32>
    %12 = vector.shape_cast %11 : vector<1x1x1x128xf32> to vector<1x128xf32>
    %13 = vector.shape_cast %10 : vector<1x128xf32> to vector<1x1x1x128xf32>
    tpu.vector_store %arg4[%c0_8, %c0_9, %c0_10, %c0_11], %13 {strides = array<i32>} : memref<1x2x1x128xf32, #tpu.memory_space<vmem>>, vector<1x1x1x128xf32>,
    %c0_12 = arith.constant 0 : index
    %c1 = arith.constant 1 : index
    %c0_13 = arith.constant 0 : index
    %c0_14 = arith.constant 0 : index
    %14 = vector.load %arg4[%c0_12, %c1, %c0_13, %c0_14] : memref<1x2x1x128xf32, #tpu.memory_space<vmem>>, vector<1x1x1x128xf32>
    %15 = vector.shape_cast %14 : vector<1x1x1x128xf32> to vector<1x128xf32>
    %16 = arith.addf %3, %4 : vector<16x128xf32>
    %cst_15 = arith.constant dense<0.000000e+00> : vector<128xf32>
    %17 = vector.multi_reduction <add>, %16, %cst_15 [0] : vector<16x128xf32> to vector<128xf32>
    %18 = vector.shape_cast %17 : vector<128xf32> to vector<1x128xf32>
    %19 = arith.addf %15, %18 : vector<1x128xf32>
    %c0_16 = arith.constant 0 : index
    %c1_17 = arith.constant 1 : index
    %c0_18 = arith.constant 0 : index
    %c0_19 = arith.constant 0 : index
    %20 = vector.load %arg4[%c0_16, %c1_17, %c0_18, %c0_19] : memref<1x2x1x128xf32, #tpu.memory_space<vmem>>, vector<1x1x1x128xf32>
    %21 = vector.shape_cast %20 : vector<1x1x1x128xf32> to vector<1x128xf32>
    %22 = vector.shape_cast %19 : vector<1x128xf32> to vector<1x1x1x128xf32>
    tpu.vector_store %arg4[%c0_16, %c1_17, %c0_18, %c0_19], %22 {strides = array<i32>} : memref<1x2x1x128xf32, #tpu.memory_space<vmem>>, vector<1x1x1x128xf32>,
    return
  }
  func.func @transform_0(%arg0: i32, %arg1: i32) -> (i32, i32) {
    %c1_i32 = arith.constant 1 : i32
    %0 = arith.muli %arg0, %c1_i32 : i32
    %1 = arith.addi %0, %arg1 : i32
    %c0_i32 = arith.constant 0 : i32
    %c0_i32_0 = arith.constant 0 : i32
    return %1, %c0_i32 : i32, i32
  }
  func.func @transform_1(%arg0: i32, %arg1: i32) -> (i32, i32) {
    %c1_i32 = arith.constant 1 : i32
    %0 = arith.muli %arg0, %c1_i32 : i32
    %1 = arith.addi %0, %arg1 : i32
    %c0_i32 = arith.constant 0 : i32
    %c0_i32_0 = arith.constant 0 : i32
    return %1, %c0_i32 : i32, i32
  }
  func.func @transform_2(%arg0: i32, %arg1: i32) -> (i32, i32, i32, i32) {
    %c0_i32 = arith.constant 0 : i32
    %c0_i32_0 = arith.constant 0 : i32
    %c0_i32_1 = arith.constant 0 : i32
    %c0_i32_2 = arith.constant 0 : i32
    return %arg0, %c0_i32, %c0_i32_0, %c0_i32_1 : i32, i32, i32, i32
  }
}

</mosaic_0001>

<bundles_post_ra>
// kernel: iou_loss.1
= control target key start
LH: loop header
LB: loop body
LE: loop exit
PB: predicated region body
PF: predicated region fallthrough
CT: control target
= control target key end

     0   :  { %v109_v0 = vmov 0.0   ;;  %s155_s2 = inlined_call_operand.vmem [shape: f32[1,2,1,128], index: 2, kind: output, shape index: {}]   ;;  %s156_s0 = inlined_call_operand.vmem [shape: f32[16,128], index: 0, kind: input, shape index: {}]   ;;  %s157_s1 = inlined_call_operand.vmem [shape: f32[16,128], index: 1, kind: input, shape index: {}]  }
   0x1   :  { %59 = vst [vmem:[%s155_s2] sm:$0x1] %v109_v0  ;;  %60 = vst [vmem:[%s155_s2 + $0x1] sm:$0x1] %v109_v0  ;;  %v61_v1 = vld [vmem:[%s156_s0] sm:$0xff]  ;;  %v62_v2 = vld [vmem:[%s156_s0 + $0x8] sm:$0xff] }
   0x2   :  { %v63_v3 = vld [vmem:[%s157_s1] sm:$0xff]  ;;  %v64_v4 = vld [vmem:[%s157_s1 + $0x8] sm:$0xff] }
   0x3   :  { %v66_v5 = vmul.f32 %v63_v3, %v61_v1  ;;  %v79_v6 = vadd.f32 %v63_v3, %v61_v1  ;;  %v67_v7 = vmul.f32 %v64_v4, %v62_v2  ;;  %v80_v8 = vadd.f32 %v64_v4, %v62_v2 }
   0x5   :  { %v68_v9 = vadd.f32 %v67_v7, %v66_v5  ;;  %v81_v10 = vadd.f32 %v80_v8, %v79_v6 }
   0x7   :  { %v69_v11 = vrot.slane %v68_v9, 4  ;;  %v82_v12 = vrot.slane %v81_v10, 4 }
   0x8   :  { %v65_v21 = vld [vmem:[%s155_s2] sm:$0x1]  ;;  %v106_v22 = vld [vmem:[%s155_s2 + $0x1] sm:$0x1] }
   0x9   :  { %v70_v13 = vadd.f32 %v69_v11, %v68_v9  ;;  %v83_v14 = vadd.f32 %v82_v12, %v81_v10 }
   0xb   :  { %v71_v15 = vrot.slane %v70_v13, 2  ;;  %v84_v16 = vrot.slane %v83_v14, 2 }
   0xd   :  { %v72_v17 = vadd.f32 %v71_v15, %v70_v13  ;;  %v85_v18 = vadd.f32 %v84_v16, %v83_v14 }
   0xf   :  { %v73_v19 = vrot.slane %v72_v17, 1  ;;  %v86_v20 = vrot.slane %v85_v18, 1 }
  0x11   :  { %v74_v23 = vadd.f32 %v73_v19, %v72_v17  ;;  %v87_v24 = vadd.f32 %v86_v20, %v85_v18 }
  0x13   :  { %v75_v25 = vadd.f32 %v74_v23, %v65_v21  ;;  %v88_v26 = vadd.f32 %v106_v22, %v87_v24 }
  0x15   :  { %76 = vst [vmem:[%s155_s2] sm:$0x1] %v75_v25  ;;  %107 = vst [vmem:[%s155_s2 + $0x1] sm:$0x1] %v88_v26 }

</bundles_post_ra>
